<compile_context>
chip_gen: v6e
topology: v6e:2x2x1
jax: 0.10.0
libtpu: 0.0.40
codegen_flags: <defaults>
</compile_context>

<pallas_src>
import jax
import jax.numpy as jnp
from jax.experimental import pallas as pl
from jax.experimental.pallas import tpu as pltpu

_LANES = 128


def _cdiv(a, b):
    return (a + b - 1) // b


def _round_up(a, b):
    return ((a + b - 1) // b) * b


def _sublane_granule(dtype):
    # Sub-32-bit dtypes pack along sublanes: 8 rows for 4-byte elements,
    # 16 for 2-byte (bf16), 32 for 1-byte (int8 / fp8).
    itemsize = jnp.dtype(dtype).itemsize
    return max(8, 32 // int(itemsize))


def _make_kernel(apply_sigmoid: bool, use_bias: bool):
    def _body(z, bias):
        if use_bias:
            z = z + bias
        if apply_sigmoid:
            # sigmoid(z) = 0.5 * (tanh(z/2) + 1): single EUP op, exact in f32,
            # no overflow path for very negative logits.
            z = 0.5 * (jnp.tanh(0.5 * z) + 1.0)
        return z

    if use_bias:
        def kernel(bias_ref, x_ref, o_ref):
            z = _body(x_ref[...].astype(jnp.float32), bias_ref[0, 0])
            o_ref[...] = z.astype(o_ref.dtype)
    else:
        def kernel(x_ref, o_ref):
            z = _body(x_ref[...].astype(jnp.float32), None)
            o_ref[...] = z.astype(o_ref.dtype)
    return kernel


def prediction_layer(x, bias=None, task="binary", use_bias=True, block_rows=4096):
    """JAX wrapper mirroring PredictionLayer.forward."""
    if task not in ("binary", "multiclass", "regression"):
        raise ValueError("task must be binary,multiclass,regression!")

    apply_sigmoid = task == "binary"
    if not apply_sigmoid and not use_bias:
        # Pure identity: nothing to compute.
        return x

    orig_shape = x.shape
    n = int(x.size)
    if n == 0:
        return x

    # Lane-dense view: flatten and view as [rows, 128].  Only the (<128-elem)
    # tail is padded; rows are NOT rounded up to a tile multiple — the final
    # partial block is masked by Pallas.  When n % 128 == 0 this path adds no
    # extra HBM passes at all (reshape in, reshape out).
    rows = _cdiv(n, _LANES)
    pad = rows * _LANES - n
    x_flat = x.reshape(-1)
    if pad:
        x_flat = jnp.pad(x_flat, (0, pad))
    x2d = x_flat.reshape(rows, _LANES)

    granule = _sublane_granule(x.dtype)
    # ~2 MiB f32 tile by default; double-buffered in+out ≈ 8 MiB (fits v5e's
    # 16 MiB scoped-VMEM default and v6e/v7x's 32 MiB).
    tile_rows = _round_up(min(int(block_rows), rows), granule)
    grid = (_cdiv(rows, tile_rows),)

    in_specs = [pl.BlockSpec((tile_rows, _LANES), lambda i: (i, 0))]
    args = [x2d]
    if use_bias:
        if bias is None:
            bias_arr = jnp.zeros((1, 1), jnp.float32)
        else:
            bias_arr = jnp.asarray(bias, dtype=jnp.float32).reshape((1, 1))
        in_specs = [pl.BlockSpec((1, 1), lambda i: (0, 0))] + in_specs
        args = [bias_arr] + args

    out2d = pl.pallas_call(
        _make_kernel(apply_sigmoid, use_bias),
        out_shape=jax.ShapeDtypeStruct((rows, _LANES), x.dtype),
        grid=grid,
        in_specs=in_specs,
        out_specs=pl.BlockSpec((tile_rows, _LANES), lambda i: (i, 0)),
        compiler_params=pltpu.CompilerParams(
            # Row-tiles are independent: shard across v7x's two TensorCores.
            dimension_semantics=("parallel",),
        ),
    )(*args)

    if pad:
        return out2d.reshape(-1)[:n].reshape(orig_shape)
    return out2d.reshape(orig_shape)


if __name__ == "__main__":
    key = jax.random.PRNGKey(0)
    k1, k2, k3 = jax.random.split(key, 3)

    # Learned scalar bias (nn.Parameter(torch.zeros((1,))) after some training).
    bias = jnp.array([0.25], dtype=jnp.float32)

    # --- binary task, [batch, 1] logits as produced by DeepCTR's final linear ---
    batch = 8
    x = jax.random.normal(k1, (batch, 1), dtype=jnp.float32)
    out = jax.block_until_ready(prediction_layer(x, bias, task="binary", use_bias=True))
    ref = jax.nn.sigmoid(x + bias)
    assert out.shape == x.shape and out.dtype == x.dtype
    assert jnp.allclose(out, ref, atol=1e-5, rtol=1e-5), "binary path mismatch"

    # --- regression task with bias (no sigmoid), non-[B,1] shape (tail-padded path) ---
    xr = jax.random.normal(k2, (6, 5), dtype=jnp.float32)
    outr = jax.block_until_ready(prediction_layer(xr, bias, task="regression", use_bias=True))
    assert jnp.allclose(outr, xr + bias, atol=1e-6), "regression path mismatch"

    # --- multi-tile grid path (small tile override, n % 128 == 0 so zero-copy) ---
    xg = jax.random.normal(k3, (2048, 1), dtype=jnp.float32)
    outg = jax.block_until_ready(
        prediction_layer(xg, bias, task="binary", use_bias=True, block_rows=8)
    )
    assert jnp.allclose(outg, jax.nn.sigmoid(xg + bias), atol=1e-5, rtol=1e-5), \
        "gridded path mismatch"

    # --- binary, no bias ---
    outn = jax.block_until_ready(prediction_layer(x, None, task="binary", use_bias=False))
    assert jnp.allclose(outn, jax.nn.sigmoid(x), atol=1e-5, rtol=1e-5), "no-bias path mismatch"

    # --- no-bias, non-binary task is the identity ---
    outi = prediction_layer(xr, None, task="regression", use_bias=False)
    assert outi is xr

    print("KERNEL_OK")
</pallas_src>

<mosaic_0001>
module attributes {stable_mosaic.version = 11 : i64} {
  func.func @kernel(%arg0: i32, %arg1: memref<1x1xf32, #tpu.memory_space<vmem>>, %arg2: memref<8x128xf32, #tpu.memory_space<vmem>>, %arg3: memref<8x128xf32, #tpu.memory_space<vmem>>) attributes {dimension_semantics = [#tpu.dimension_semantics<parallel>], iteration_bounds = array<i64: 1>, scalar_prefetch = 0 : i64, scratch_operands = 0 : i64, tpu.core_type = #tpu.core_type<tc>, window_params = [{pipeline_mode = #tpu.pipeline_mode<synchronous>, transform_indices = @transform_0, window_bounds = array<i64: 1, 1>}, {transform_indices = @transform_1, window_bounds = array<i64: 8, 128>}, {transform_indices = @transform_2, window_bounds = array<i64: 8, 128>}]} {
    %c0 = arith.constant 0 : index
    %c0_0 = arith.constant 0 : index
    %0 = vector.load %arg2[%c0, %c0_0] : memref<8x128xf32, #tpu.memory_space<vmem>>, vector<8x128xf32>
    %c0_1 = arith.constant 0 : index
    %c0_2 = arith.constant 0 : index
    %1 = vector.load %arg1[%c0_1, %c0_2] : memref<1x1xf32, #tpu.memory_space<vmem>>, vector<1x1xf32>
    %2 = vector.extract %1[0, 0] : f32 from vector<1x1xf32>
    %3 = vector.broadcast %2 : f32 to vector<8x128xf32>
    %4 = arith.addf %0, %3 : vector<8x128xf32>
    %cst = arith.constant 5.000000e-01 : f32
    %5 = vector.broadcast %cst : f32 to vector<8x128xf32>
    %6 = arith.mulf %5, %4 : vector<8x128xf32>
    %7 = math.tanh %6 : vector<8x128xf32>
    %cst_3 = arith.constant 1.000000e+00 : f32
    %8 = vector.broadcast %cst_3 : f32 to vector<8x128xf32>
    %9 = arith.addf %7, %8 : vector<8x128xf32>
    %cst_4 = arith.constant 5.000000e-01 : f32
    %10 = vector.broadcast %cst_4 : f32 to vector<8x128xf32>
    %11 = arith.mulf %10, %9 : vector<8x128xf32>
    %c0_5 = arith.constant 0 : index
    %c0_6 = arith.constant 0 : index
    %12 = vector.load %arg3[%c0_5, %c0_6] : memref<8x128xf32, #tpu.memory_space<vmem>>, vector<8x128xf32>
    tpu.vector_store %arg3[%c0_5, %c0_6], %11 {strides = array<i32>} : memref<8x128xf32, #tpu.memory_space<vmem>>, vector<8x128xf32>,
    return
  }
  func.func @transform_0(%arg0: i32) -> (i32, i32) {
    %c0_i32 = arith.constant 0 : i32
    %c0_i32_0 = arith.constant 0 : i32
    %c0_i32_1 = arith.constant 0 : i32
    return %c0_i32, %c0_i32_0 : i32, i32
  }
  func.func @transform_1(%arg0: i32) -> (i32, i32) {
    %c0_i32 = arith.constant 0 : i32
    %c0_i32_0 = arith.constant 0 : i32
    return %arg0, %c0_i32 : i32, i32
  }
  func.func @transform_2(%arg0: i32) -> (i32, i32) {
    %c0_i32 = arith.constant 0 : i32
    %c0_i32_0 = arith.constant 0 : i32
    return %arg0, %c0_i32 : i32, i32
  }
}

</mosaic_0001>

<bundles_post_ra>
// kernel: tpu_custom_call.1
= control target key start
LH: loop header
LB: loop body
LE: loop exit
PB: predicated region body
PF: predicated region fallthrough
CT: control target
= control target key end

     0   :  { %s96_s0 = inlined_call_operand.<no memory space> [shape: f32[1,1], index: 0, kind: input, shape index: {}]   ;;  %s97_s1 = inlined_call_operand.vmem [shape: f32[1,128], index: 1, kind: input, shape index: {}]   ;;  %s98_s2 = inlined_call_operand.hbm [shape: f32[1,128], index: 2, kind: output, shape index: {}]  }
   0x1   :  { %v7_v0 = vstv %s96_s0 }
   0x2   :  { %8 = vst [vmem:[#allocation2] sm:$0x1] %v7_v0 }
   0x3   :  { %9 = vsyncpa [#allocation4], 0  ;;  %v14_v2 = vld [vmem:[%s97_s1] sm:$0xff] }
   0x9   :  { %v15_v1 = vld [vmem:[#allocation2] sm:$0x1] }
   0xa   :  { %40 = vpush %v15_v1 }
  0x3b   :  { %s41_s13 = spop %40 }
  0x3c   :  { %v17_v3 = vstv %s41_s13 }
  0x3d   :  { %v18_v4 = vadd.f32 %v17_v3, %v14_v2 }
  0x3f   :  { %v19_v5 = vmul.f32 0.5, %v18_v4 }
  0x41   :  { %45 = vtanh.f32 %v19_v5 }
  0x4e   :  { %v46_v6 = vpop.eup %45 }
  0x4f   :  { %v21_v7 = vadd.f32 1.0, %v46_v6 }
  0x51   :  { %v22_v8 = vmul.f32 0.5, %v21_v7 }
  0x53   :  { %23 = vst [vmem:[#allocation3] sm:$0xff] %v22_v8 }
  0x54   :  { %28 = vsyncadd [#allocation4], 112  ;;  %s69_s14 = smov [#allocation3]  }
  0x55   :  { %s29_s0 = sshll.u32 %s69_s14, 4  ;;  %s30_s0 = int_to_ptr.vmem [resolvable:$true] %s29_s0 }
  0x56   :  { %s47_s15 = scalar_lea.vmem %s30_s0, 16  ;;  %s51_s16 = scalar_lea.vmem %s30_s0, 128 }
  0x57   :  { %p48_p0 = scmp.ne.s32.totalorder %s30_s0, %s47_s15  ;;  %p52_p1 = scmp.lt.s32.totalorder %s30_s0, %s30_s0 }
  0x58   :  { %p53_p2 = scmp.lt.s32.totalorder %s51_s16, %s47_s15 }
  0x5a   :  { %p54_p3 = por %p53_p2, %p52_p1 }
  0x5c   :  { %p55_p4 = pnand %p54_p3, %p48_p0 }
  0x5e   :  { %58 = shalt.err (!%p55_p4)
}
  0x5f   :  { %s70_s1 = smov 16   ;;  %s71_s17 = smov 1  }
  0x60   :  { %35 = dma.vmem_to_hbm [thread:$0]  %s30_s0, 16, %s98_s2, [#allocation4], %s70_s1, %s70_s1, %s71_s17  }
  0x61   :  { %67 = dma.done.wait [#allocation4], 128  }
  0x62   :  { %68 = vsyncadd [#allocation4], 4294967168 }
  0x63   :  { %39 = vsyncpa [#allocation4], 1 }

</bundles_post_ra>
